<compile_context>
chip_gen: v7x
topology: tpu7x:2x2x1
jax: 0.10.0
libtpu: 0.0.40
codegen_flags: <defaults>
</compile_context>

<pallas_src>
import functools

import jax
import jax.numpy as jnp
from jax.experimental import pallas as pl
from jax.experimental.pallas import tpu as pltpu

LANE = 128
ROW_BLOCK = 256                      # N is padded to a multiple of this
X_RESIDENT_BUDGET = 4 * 1024 * 1024  # per-buffer bytes for a resident X/h1


def _round_up(x, m):
    return (x + m - 1) // m * m


def _pad2d(a, rows, cols):
    return jnp.pad(a, ((0, rows - a.shape[0]), (0, cols - a.shape[1])))


def _pick_reduce_tile(n_p):
    for t in (512, 256, 128):
        if n_p % t == 0:
            return t
    return n_p


def _pick_row_tile(n_p):
    # keep >= 2 row tiles so the "parallel" axis can use both v7x TensorCores
    for t in (512, 256, 128):
        if n_p % t == 0 and n_p // t >= 2:
            return t
    return _pick_reduce_tile(n_p)


# ------------------------------ Pallas kernel ------------------------------ #

def sage_layer_kernel(a_ref, xk_ref, xi_ref, ws_ref, wn_ref, b_ref, o_ref,
                      acc_ref, *, apply_relu, tk, x_resident):
    """One SAGEConv ('mean') layer at one (row-tile i, reduce-tile k) grid step.

    a_ref   : (TM, TK)        row-normalized adjacency tile (bf16)
    xk_ref  : (TK, F) or (N, F) feature rows for aggregation (bf16)
    xi_ref  : (TM, F)         feature rows for this row tile, self term (bf16)
    ws_ref  : (F, H)          self weight (bf16)
    wn_ref  : (F, H)          neighbor weight (bf16)
    b_ref   : (1, H)          bias (f32)
    o_ref   : (TM, H)         output tile (resident across the k axis)
    acc_ref : (TM, F)         f32 scratch: running neighbor-mean for this tile
    """
    k = pl.program_id(1)

    @pl.when(k == 0)
    def _init():
        acc_ref[...] = jnp.zeros_like(acc_ref)

    if x_resident:
        start = pl.multiple_of(k * tk, tk)
        xk = xk_ref[pl.ds(start, tk), :]
    else:
        xk = xk_ref[...]

    # Mean-aggregation partial sum: acc += A[i, k] @ X[k]  (f32 accumulate).
    acc_ref[...] += jnp.dot(a_ref[...], xk, preferred_element_type=jnp.float32)

    # Finalize once per row tile: self dot + neighbor dot, bias, ReLU.
    @pl.when(k == pl.num_programs(1) - 1)
    def _finalize():
        h = jnp.dot(xi_ref[...], ws_ref[...],
                    preferred_element_type=jnp.float32)
        h = h + jnp.dot(acc_ref[...].astype(wn_ref.dtype), wn_ref[...],
                        preferred_element_type=jnp.float32)
        h = h + b_ref[...]
        if apply_relu:
            h = jnp.maximum(h, 0.0)
        o_ref[...] = h.astype(o_ref.dtype)


def _sage_layer(a_norm, x, w_self, w_neigh, b, *, apply_relu, tm, tk,
                out_dtype, x_resident):
    """h = x @ w_self + (A @ x) @ w_neigh + b (optionally ReLU). Pre-padded."""
    n = a_norm.shape[0]
    f = x.shape[1]
    h_dim = w_self.shape[1]
    assert n % tm == 0 and n % tk == 0, (n, tm, tk)

    if x_resident:
        # Whole (padded) feature matrix resident in VMEM: constant block index
        # means it is DMA'd from HBM only once, sliced per k step in-kernel.
        xk_spec = pl.BlockSpec((n, f), lambda i, k: (0, 0))
    else:
        xk_spec = pl.BlockSpec((tk, f), lambda i, k: (k, 0))

    kernel = functools.partial(sage_layer_kernel, apply_relu=apply_relu,
                               tk=tk, x_resident=x_resident)
    return pl.pallas_call(
        kernel,
        out_shape=jax.ShapeDtypeStruct((n, h_dim), out_dtype),
        grid_spec=pltpu.PrefetchScalarGridSpec(
            num_scalar_prefetch=0,
            grid=(n // tm, n // tk),
            in_specs=[
                pl.BlockSpec((tm, tk), lambda i, k: (i, k)),       # A tile
                xk_spec,                                           # X (reduce)
                pl.BlockSpec((tm, f), lambda i, k: (i, 0)),        # X (self)
                pl.BlockSpec((f, h_dim), lambda i, k: (0, 0)),     # W_self
                pl.BlockSpec((f, h_dim), lambda i, k: (0, 0)),     # W_neigh
                pl.BlockSpec((1, h_dim), lambda i, k: (0, 0)),     # bias
            ],
            out_specs=pl.BlockSpec((tm, h_dim), lambda i, k: (i, 0)),
            scratch_shapes=[pltpu.VMEM((tm, f), jnp.float32)],
        ),
        compiler_params=pltpu.CompilerParams(
            dimension_semantics=("parallel", "arbitrary"),
            vmem_limit_bytes=64 * 1024 * 1024),
    )(a_norm, x, x, w_self, w_neigh, b)


def sage_forward(a_norm, x, params):
    """Two-layer SAGE forward: pad to lane-dense shapes, cast streamed data to
    bf16 (f32 accumulation inside the kernel), run two tiled pallas_calls
    (layer 1 + ReLU, layer 2), slice padding off the result."""
    ws1, wn1, b1, ws2, wn2, b2 = params
    n, in_f = x.shape
    hid = ws1.shape[1]
    out_f = ws2.shape[1]

    n_p = _round_up(n, ROW_BLOCK)
    f_p = _round_up(in_f, LANE)
    h1_p = _round_up(hid, LANE)
    h2_p = _round_up(out_f, LANE)

    tk = _pick_reduce_tile(n_p)
    tm = _pick_row_tile(n_p)

    cdt = jnp.bfloat16
    a_p = _pad2d(a_norm, n_p, n_p).astype(cdt)
    x_p = _pad2d(x, n_p, f_p).astype(cdt)

    ws1_p = _pad2d(ws1, f_p, h1_p).astype(cdt)
    wn1_p = _pad2d(wn1, f_p, h1_p).astype(cdt)
    b1_p = _pad2d(b1.reshape(1, -1), 1, h1_p).astype(jnp.float32)
    ws2_p = _pad2d(ws2, h1_p, h2_p).astype(cdt)
    wn2_p = _pad2d(wn2, h1_p, h2_p).astype(cdt)
    b2_p = _pad2d(b2.reshape(1, -1), 1, h2_p).astype(jnp.float32)

    x_res1 = n_p * f_p * 2 <= X_RESIDENT_BUDGET
    h1 = _sage_layer(a_p, x_p, ws1_p, wn1_p, b1_p, apply_relu=True,
                     tm=tm, tk=tk, out_dtype=cdt, x_resident=x_res1)

    x_res2 = n_p * h1_p * 2 <= X_RESIDENT_BUDGET
    h2 = _sage_layer(a_p, h1, ws2_p, wn2_p, b2_p, apply_relu=False,
                     tm=tm, tk=tk, out_dtype=jnp.float32, x_resident=x_res2)
    return h2[:n, :out_f]


def reference_forward(a_norm, x, params):
    ws1, wn1, b1, ws2, wn2, b2 = params
    h1 = jnp.maximum(x @ ws1 + (a_norm @ x) @ wn1 + b1, 0.0)
    return h1 @ ws2 + (a_norm @ h1) @ wn2 + b2


if __name__ == "__main__":
    # Small shapes consistent with the module: N nodes, 3 node features
    # (population / latitude / longitude), hid_feats=16 -> output 2*hid = 32.
    N, in_feats, hid_feats = 256, 3, 16

    key = jax.random.PRNGKey(0)
    k_adj, k_x, k1, k2, k3, k4, k5, k6 = jax.random.split(key, 8)

    # Deterministic random directed graph -> dense (dst, src) adjacency,
    # row-normalized (DGL 'mean'); zero-in-degree rows stay all-zero.
    adj = jax.random.bernoulli(k_adj, p=0.1, shape=(N, N)).astype(jnp.float32)
    indeg = adj.sum(axis=1, keepdims=True)
    a_norm = adj / jnp.maximum(indeg, 1.0)

    x = jax.random.normal(k_x, (N, in_feats), dtype=jnp.float32)

    def init_w(k, fan_in, fan_out):
        return jax.random.normal(k, (fan_in, fan_out), dtype=jnp.float32) * 0.1

    # Layer 1: in_feats -> hid ; Layer 2: hid -> 2*hid (conv3 exists but unused)
    ws1 = init_w(k1, in_feats, hid_feats)
    wn1 = init_w(k2, in_feats, hid_feats)
    b1 = jax.random.normal(k5, (1, hid_feats), dtype=jnp.float32) * 0.1
    ws2 = init_w(k3, hid_feats, 2 * hid_feats)
    wn2 = init_w(k4, hid_feats, 2 * hid_feats)
    b2 = jax.random.normal(k6, (1, 2 * hid_feats), dtype=jnp.float32) * 0.1
    params = (ws1, wn1, b1, ws2, wn2, b2)

    out = jax.block_until_ready(sage_forward(a_norm, x, params))
    ref = reference_forward(a_norm, x, params)

    assert out.shape == (N, 2 * hid_feats)
    # Tolerance accounts for bf16-cast A / X / h1 / weights (f32 accumulation).
    assert jnp.allclose(out, ref, atol=5e-2, rtol=5e-2), (
        "mismatch vs reference: max abs err "
        f"{float(jnp.max(jnp.abs(out - ref)))}")

    print("KERNEL_OK")
</pallas_src>

<mosaic_0001>
module attributes {stable_mosaic.version = 11 : i64} {
  func.func @sage_layer_kernel(%arg0: i32, %arg1: i32, %arg2: memref<128x256xbf16, #tpu.memory_space<vmem>>, %arg3: memref<256x128xbf16, #tpu.memory_space<vmem>>, %arg4: memref<128x128xbf16, #tpu.memory_space<vmem>>, %arg5: memref<128x128xbf16, #tpu.memory_space<vmem>>, %arg6: memref<128x128xbf16, #tpu.memory_space<vmem>>, %arg7: memref<1x128xf32, #tpu.memory_space<vmem>>, %arg8: memref<128x128xbf16, #tpu.memory_space<vmem>>, %arg9: memref<128x128xf32, #tpu.memory_space<vmem>>) attributes {dimension_semantics = [#tpu.dimension_semantics<parallel>, #tpu.dimension_semantics<arbitrary>], iteration_bounds = array<i64: 2, 1>, scalar_prefetch = 0 : i64, scratch_operands = 1 : i64, tpu.core_type = #tpu.core_type<tc>, window_params = [{transform_indices = @transform_0, window_bounds = array<i64: 128, 256>}, {pipeline_mode = #tpu.pipeline_mode<synchronous>, transform_indices = @transform_1, window_bounds = array<i64: 256, 128>}, {transform_indices = @transform_2, window_bounds = array<i64: 128, 128>}, {pipeline_mode = #tpu.pipeline_mode<synchronous>, transform_indices = @transform_3, window_bounds = array<i64: 128, 128>}, {pipeline_mode = #tpu.pipeline_mode<synchronous>, transform_indices = @transform_4, window_bounds = array<i64: 128, 128>}, {pipeline_mode = #tpu.pipeline_mode<synchronous>, transform_indices = @transform_5, window_bounds = array<i64: 1, 128>}, {transform_indices = @transform_6, window_bounds = array<i64: 128, 128>}]} {
    %c0_i32 = arith.constant 0 : i32
    %0 = arith.cmpi eq, %arg1, %c0_i32 : i32
    %1 = arith.extui %0 : i1 to i32
    %c0_i32_0 = arith.constant 0 : i32
    %2 = arith.cmpi ne, %1, %c0_i32_0 : i32
    scf.if %2 {
      %cst_9 = arith.constant 0.000000e+00 : f32
      %15 = vector.broadcast %cst_9 : f32 to vector<128x128xf32>
      %c0_10 = arith.constant 0 : index
      %c0_11 = arith.constant 0 : index
      %16 = vector.load %arg9[%c0_10, %c0_11] : memref<128x128xf32, #tpu.memory_space<vmem>>, vector<128x128xf32>
      tpu.vector_store %arg9[%c0_10, %c0_11], %15 {strides = array<i32>} : memref<128x128xf32, #tpu.memory_space<vmem>>, vector<128x128xf32>,
    } else {
    }
    %c256_i32 = arith.constant 256 : i32
    %3 = arith.muli %arg1, %c256_i32 : i32
    %4 = tpu.assume_multiple %3, 256 : i32
    %5 = arith.index_cast %4 : i32 to index
    %c0 = arith.constant 0 : index
    %6 = vector.load %arg3[%5, %c0] : memref<256x128xbf16, #tpu.memory_space<vmem>>, vector<256x128xbf16>
    %c0_1 = arith.constant 0 : index
    %c0_2 = arith.constant 0 : index
    %7 = vector.load %arg9[%c0_1, %c0_2] : memref<128x128xf32, #tpu.memory_space<vmem>>, vector<128x128xf32>
    %c0_3 = arith.constant 0 : index
    %c0_4 = arith.constant 0 : index
    %8 = vector.load %arg2[%c0_3, %c0_4] : memref<128x256xbf16, #tpu.memory_space<vmem>>, vector<128x256xbf16>
    %cst = arith.constant dense<0.000000e+00> : vector<128x128xf32>
    %9 = tpu.matmul %8, %6, %cst {dimension_numbers = #tpu.dot_dimension_numbers<[1], [0], [0], [1], [0, 0, 1, 1], [], []>} : vector<128x256xbf16>, vector<256x128xbf16>, vector<128x128xf32> -> vector<128x128xf32>
    %10 = arith.addf %7, %9 : vector<128x128xf32>
    %c0_5 = arith.constant 0 : index
    %c0_6 = arith.constant 0 : index
    %11 = vector.load %arg9[%c0_5, %c0_6] : memref<128x128xf32, #tpu.memory_space<vmem>>, vector<128x128xf32>
    tpu.vector_store %arg9[%c0_5, %c0_6], %10 {strides = array<i32>} : memref<128x128xf32, #tpu.memory_space<vmem>>, vector<128x128xf32>,
    %c0_i32_7 = arith.constant 0 : i32
    %12 = arith.cmpi eq, %arg1, %c0_i32_7 : i32
    %13 = arith.extui %12 : i1 to i32
    %c0_i32_8 = arith.constant 0 : i32
    %14 = arith.cmpi ne, %13, %c0_i32_8 : i32
    scf.if %14 {
      %c0_9 = arith.constant 0 : index
      %c0_10 = arith.constant 0 : index
      %15 = vector.load %arg4[%c0_9, %c0_10] : memref<128x128xbf16, #tpu.memory_space<vmem>>, vector<128x128xbf16>
      %c0_11 = arith.constant 0 : index
      %c0_12 = arith.constant 0 : index
      %16 = vector.load %arg5[%c0_11, %c0_12] : memref<128x128xbf16, #tpu.memory_space<vmem>>, vector<128x128xbf16>
      %cst_13 = arith.constant dense<0.000000e+00> : vector<128x128xf32>
      %17 = tpu.matmul %15, %16, %cst_13 {dimension_numbers = #tpu.dot_dimension_numbers<[1], [0], [0], [1], [0, 0, 1, 1], [], []>} : vector<128x128xbf16>, vector<128x128xbf16>, vector<128x128xf32> -> vector<128x128xf32>
      %c0_14 = arith.constant 0 : index
      %c0_15 = arith.constant 0 : index
      %18 = vector.load %arg9[%c0_14, %c0_15] : memref<128x128xf32, #tpu.memory_space<vmem>>, vector<128x128xf32>
      %19 = arith.truncf %18 : vector<128x128xf32> to vector<128x128xbf16>
      %c0_16 = arith.constant 0 : index
      %c0_17 = arith.constant 0 : index
      %20 = vector.load %arg6[%c0_16, %c0_17] : memref<128x128xbf16, #tpu.memory_space<vmem>>, vector<128x128xbf16>
      %cst_18 = arith.constant dense<0.000000e+00> : vector<128x128xf32>
      %21 = tpu.matmul %19, %20, %cst_18 {dimension_numbers = #tpu.dot_dimension_numbers<[1], [0], [0], [1], [0, 0, 1, 1], [], []>} : vector<128x128xbf16>, vector<128x128xbf16>, vector<128x128xf32> -> vector<128x128xf32>
      %22 = arith.addf %17, %21 : vector<128x128xf32>
      %c0_19 = arith.constant 0 : index
      %c0_20 = arith.constant 0 : index
      %23 = vector.load %arg7[%c0_19, %c0_20] : memref<1x128xf32, #tpu.memory_space<vmem>>, vector<1x128xf32>
      %24 = vector.broadcast %23 : vector<1x128xf32> to vector<128x128xf32>
      %25 = arith.addf %22, %24 : vector<128x128xf32>
      %cst_21 = arith.constant 0.000000e+00 : f32
      %26 = vector.broadcast %cst_21 : f32 to vector<128x128xf32>
      %27 = arith.maximumf %25, %26 : vector<128x128xf32>
      %28 = arith.truncf %27 : vector<128x128xf32> to vector<128x128xbf16>
      %c0_22 = arith.constant 0 : index
      %c0_23 = arith.constant 0 : index
      %29 = vector.load %arg8[%c0_22, %c0_23] : memref<128x128xbf16, #tpu.memory_space<vmem>>, vector<128x128xbf16>
      tpu.vector_store %arg8[%c0_22, %c0_23], %28 {strides = array<i32>} : memref<128x128xbf16, #tpu.memory_space<vmem>>, vector<128x128xbf16>,
    } else {
    }
    return
  }
  func.func @transform_0(%arg0: i32, %arg1: i32) -> (i32, i32) {
    %c0_i32 = arith.constant 0 : i32
    return %arg0, %arg1 : i32, i32
  }
  func.func @transform_1(%arg0: i32, %arg1: i32) -> (i32, i32) {
    %c0_i32 = arith.constant 0 : i32
    %c0_i32_0 = arith.constant 0 : i32
    %c0_i32_1 = arith.constant 0 : i32
    return %c0_i32, %c0_i32_0 : i32, i32
  }
  func.func @transform_2(%arg0: i32, %arg1: i32) -> (i32, i32) {
    %c0_i32 = arith.constant 0 : i32
    %c0_i32_0 = arith.constant 0 : i32
    return %arg0, %c0_i32 : i32, i32
  }
  func.func @transform_3(%arg0: i32, %arg1: i32) -> (i32, i32) {
    %c0_i32 = arith.constant 0 : i32
    %c0_i32_0 = arith.constant 0 : i32
    %c0_i32_1 = arith.constant 0 : i32
    return %c0_i32, %c0_i32_0 : i32, i32
  }
  func.func @transform_4(%arg0: i32, %arg1: i32) -> (i32, i32) {
    %c0_i32 = arith.constant 0 : i32
    %c0_i32_0 = arith.constant 0 : i32
    %c0_i32_1 = arith.constant 0 : i32
    return %c0_i32, %c0_i32_0 : i32, i32
  }
  func.func @transform_5(%arg0: i32, %arg1: i32) -> (i32, i32) {
    %c0_i32 = arith.constant 0 : i32
    %c0_i32_0 = arith.constant 0 : i32
    %c0_i32_1 = arith.constant 0 : i32
    return %c0_i32, %c0_i32_0 : i32, i32
  }
  func.func @transform_6(%arg0: i32, %arg1: i32) -> (i32, i32) {
    %c0_i32 = arith.constant 0 : i32
    %c0_i32_0 = arith.constant 0 : i32
    return %arg0, %c0_i32 : i32, i32
  }
}

</mosaic_0001>

<bundles_post_ra>
// kernel: tpu_custom_call.1
= control target key start
LH: loop header
LB: loop body
LE: loop exit
PB: predicated region body
PF: predicated region fallthrough
CT: control target
= control target key end

     0   :  { %s2703_s0 = inlined_call_operand.hbm [shape: bf16[256,256], index: 0, kind: input, shape index: {}]   ;;  %s2704_s1 = inlined_call_operand.hbm [shape: bf16[256,128], index: 1, kind: input, shape index: {}]   ;;  %s2705_s2 = inlined_call_operand.hbm [shape: bf16[256,128], index: 2, kind: input, shape index: {}]   ;;  %s2706_s3 = inlined_call_operand.hbm [shape: bf16[128,128], index: 3, kind: input, shape index: {}]   ;;  %s2707_s4 = inlined_call_operand.hbm [shape: bf16[128,128], index: 4, kind: input, shape index: {}]   ;;  %s2708_s5 = inlined_call_operand.hbm [shape: f32[1,128], index: 5, kind: input, shape index: {}]   ;;  %s2709_s6 = inlined_call_operand.hbm [shape: bf16[256,128], index: 6, kind: output, shape index: {}]  }
   0x1   :  { %2730 = sst [smem:[#allocation26_spill]] %s2703_s0 }
   0x2   :  { %2731 = sst [smem:[#allocation27_spill]] %s2704_s1 }
   0x3   :  { %2732 = sst [smem:[#allocation28_spill]] %s2707_s4 }
   0x4   :  { %2733 = sst [smem:[#allocation29_spill]] %s2709_s6 }
   0x5   :  { %11 = vsyncpa [#allocation4], 0 }
   0x6   :  { %13 = vsyncpa [#allocation4 + $0x1], 0 }
   0x7   :  { %14 = vsyncpa [#allocation7], 0 }
   0x8   :  { %15 = vsyncpa [#allocation11], 0 }
   0x9   :  { %16 = vsyncpa [#allocation5], 0 }
   0xa   :  { %18 = vsyncpa [#allocation5 + $0x1], 0  ;;  %s2311_s21 = smov 0   ;;  %s2313_s22 = smov 0  }
   0xb   :  { %s2315_s23 = smov 0   ;;  %s2317_s24 = smov 0  }
   0xc   :  { %s2319_s25 = smov 0   ;;  %s2321_s26 = smov 0  }
   0xd LB: > { %2734 = sst [smem:[#allocation20_spill]] %s2241_s21  ;;  %s2342_s27 = sadd.s32 4294967295, %s2261_s26   ;;  %s2261_s26 = sphi %s2321_s26, %s24_s26   ;;  %s2257_s25 = sphi %s2319_s25, %s2778_s25   ;;  %s2253_s24 = sphi %s2317_s24, %s2777_s24   ;;  %s2249_s23 = sphi %s2315_s23, %s2773_s23   ;;  %s2245_s22 = sphi %s2313_s22, %s2776_s22   ;;  %s2241_s21 = sphi %s2311_s21, %s2775_s21  }
   0xe   : > { %2735 = sst [smem:[#allocation21_spill]] %s2249_s23  ;;  %s1470_s28 = sadd.s32 4294967294, %s2261_s26  }
   0xf   : > { %2736 = sst [smem:[#allocation22_spill]] %s2261_s26  ;;  %p58_p0 = scmp.ne.s32.totalorder %s2245_s22, %s2241_s21 }
  0x10   : > { %p2710_p1 = scmp.eq.s32.totalorder %s2342_s27, 0  ;;  %p198_p3 = scmp.eq.s32.totalorder %s1470_s28, 1 }
  0x11   : > { %p1471_p5 = scmp.ge.s32.totalorder %s2261_s26, 1  ;;  %p205_p7 = scmp.lt.s32.totalorder %s2261_s26, 3 }
  0x12   : > { %p2351_p4 = por %p2710_p1, %p58_p0  ;;  %p2356_p6 = por %p198_p3, %p58_p0 }
  0x13   : > { %p2361_p8 = pnand %p1471_p5, %p205_p7  ;;  %s2263_s8 = smov [#allocation6]  }
  0x14   : > { %s2737_s29 = scalar_select %p2351_p4, 1, 0 }
  0x15   : > { %s2738_s30 = scalar_select %p2356_p6, 1, 0 }
  0x16   : > { %s2740_s7 = scalar_select %p2361_p8, 1, 0 }
  0x17   : > { %2739 = sst [smem:[#allocation23_spill]] %s2738_s30  ;;  %s217_s9 = sshll.u32 %s2263_s8, 4  ;;  %s2365_s9 = int_to_ptr.vmem [resolvable:$true] %s217_s9 }
  0x18   : > { %p1835_p9 = pneg %p2361_p8  ;;  %s2264_s11 = smov [#allocation10]  }
  0x19   : > { %s243_s12 = sshll.u32 %s2264_s11, 4  ;;  %s2742_s1 = sld [smem:[#allocation27_spill]]  ;;  %s2376_s12 = int_to_ptr.vmem [resolvable:$true] %s243_s12 }
  0x1a   : > { %p2372_p11 = pnand %p1835_p9, %p2710_p1 }
  0x1c   : > { %s2741_s10 = scalar_select %p2372_p11, 1, 0 }
  0x1d   : > { %p2386_p13 = pneg %p2372_p11 }
  0x1f   : > { %s1991_s15 = scalar_lea.hbm %s2742_s1, 2048 }
  0x20   : > { %p1992_p12 = scmp.ne.s32.totalorder %s2742_s1, %s1991_s15  ;;  %p1998_p5 = scmp.lt.u32.totalorder %s1991_s15, %s2742_s1 }
  0x22   : > { %p1994_p0 = pnand %p2386_p13, %p1992_p12 }
  0x24   : > { %p1995_p3 = pneg %p1994_p0 }
  0x26   : > { %p2000_p7 = pnand %p1998_p5, %p1995_p3 }
  0x28   : > { %2003 = shalt.err (!%p2000_p7)
}
  0x29   : > { %s2004_s28 = scalar_lea.vmem %s2365_s9, 2048  ;;  %p2012_p2 = scmp.lt.s32.totalorder %s2365_s9, %s2365_s9 }
  0x2a   : > { %p2005_p9 = scmp.ne.s32.totalorder %s2365_s9, %s2004_s28  ;;  %p2013_p6 = scmp.lt.s32.totalorder %s2004_s28, %s2004_s28 }
  0x2c   : > { %p2007_p10 = pnand %p2005_p9, %p2386_p13  ;;  %p2014_p12 = por %p2013_p6, %p2012_p2 }
  0x2e   : > { %p2008_p1 = pneg %p2007_p10 }
  0x30   : > { %p2015_p0 = pnand %p2014_p12, %p2008_p1 }
  0x32   : > { %2018 = shalt.err (!%p2015_p0)
}
  0x33   : > { %s2712_s8 = smov 64   ;;  %s2714_s11 = smov 4  }
  0x34   : > { %1838 = dma.hbm_to_vmem [thread:$0]  (!%p2372_p11), %s2742_s1, 2048, %s2365_s9, [#allocation7], %s2712_s8, %s2712_s8, %s2714_s11  }
  0x35   : > { %s2744_s4 = sld [smem:[#allocation28_spill]] }
  0x3b   : > { %s2019_s17 = scalar_lea.hbm %s2744_s4, 1024 }
  0x3c   : > { %p2020_p1 = scmp.ne.s32.totalorder %s2744_s4, %s2019_s17  ;;  %p2026_p10 = scmp.lt.u32.totalorder %s2019_s17, %s2744_s4 }
  0x3e   : > { %p2022_p2 = pnand %p2020_p1, %p2386_p13 }
  0x40   : > { %p2023_p6 = pneg %p2022_p2 }
  0x42   : > { %p2028_p3 = pnand %p2026_p10, %p2023_p6 }
  0x44   : > { %2031 = shalt.err (!%p2028_p3)
}
  0x45   : > { %s2032_s9 = scalar_lea.vmem %s2376_s12, 1024  ;;  %p2040_p12 = scmp.lt.s32.totalorder %s2376_s12, %s2376_s12 }
  0x46   : > { %p2033_p5 = scmp.ne.s32.totalorder %s2376_s12, %s2032_s9  ;;  %p2041_p0 = scmp.lt.s32.totalorder %s2032_s9, %s2032_s9 }
  0x48   : > { %p2035_p7 = pnand %p2033_p5, %p2386_p13  ;;  %p2042_p1 = por %p2041_p0, %p2040_p12 }
  0x4a   : > { %p2036_p9 = pneg %p2035_p7 }
  0x4c   : > { %p2043_p2 = pnand %p2042_p1, %p2036_p9 }
  0x4e   : > { %2046 = shalt.err (!%p2043_p2)
}
  0x4f   : > { %1844 = dma.hbm_to_vmem [thread:$0]  (!%p2372_p11), %s2744_s4, 1024, %s2376_s12, [#allocation11], %s2712_s8, %s2712_s8, %s2714_s11  }
  0x50   : > { %s36_s14 = sadd.s32 1, %s2257_s25  ;;  %s45_s15 = sadd.s32 1, %s2249_s23 }
  0x51   : > { %p38_p6 = scmp.ge.s32.totalorder %s36_s14, 2  ;;  %p52_p10 = scmp.ne.s32.totalorder %s2249_s23, %s2245_s22 }
  0x52   : > { %p53_p3 = scmp.eq.s32.totalorder %s2261_s26, 0  ;;  %p1863_p5 = scmp.lt.s32.totalorder %s2261_s26, 2 }
  0x53   : > { %s2780_s14 = smov (%p38_p6, %s36_s14), 0  ;;  %p2746_p9 = scmp.eq.s32.totalorder %s2342_s27, 1 }
  0x54   : > { %2745 = sst [smem:[#allocation24_spill]] %s2780_s14  ;;  %p54_p7 = por %p53_p3, %p52_p10 }
  0x55   : > { %p2446_p12 = por %p2746_p9, %p52_p10  ;;  %s40_s17 = ssub.s32 %s2257_s25, %s2780_s14 }
  0x56   : > { %s268_s19 = sand.u32 1, %s2261_s26   ;;  %p43_p0 = scmp.eq.s32.totalorder %s40_s17, 0 }
  0x57   : > { %s2747_s16 = scalar_select %p2446_p12, 1, 0 }
  0x58   : > { %s270_s20 = sand.u32 1, %s2249_s23   ;;  %s1571_s12 = sshll.u32 %s2257_s25, 11 }
  0x59   : > { %s2456_s28 = scalar_select %p43_p0, %s2249_s23, %s45_s15  }
  0x5a   : > { %s1477_s9 = sshll.u32 %s270_s20, 7  ;;  %s2749_s0 = sld [smem:[#allocation26_spill]] }
  0x5b   : > { %2748 = sst [smem:[#allocation25_spill]] %s2456_s28  ;;  %p2463_p1 = pnand %p1863_p5, %p54_p7 }
  0x5c   : > { %s272_s17 = scalar_lea.vmem [#allocation3], %s1477_s9  ;;  %s2469_s15 = sshll.u32 %s270_s20, 6 }
  0x5d   : > { %s2750_s11 = scalar_select %p2463_p1, 1, 0 }
  0x5e   : > { %s282_s1 = sshll.u32 %s272_s17, 4  ;;  %s2471_s4 = scalar_lea.sflag [#allocation4], %s268_s19  ;;  %s2467_s1 = int_to_ptr.vmem [resolvable:$true] %s282_s1 }
  0x5f   : > { %p2726_p6 = pneg %p2463_p1 }
  0x60   : > { %s2461_s8 = scalar_lea.hbm %s2749_s0, %s1571_s12  ;;  %s2052_s14 = scalar_lea.hbm %s2749_s0, 4096 }
  0x61   : > { %s2047_s12 = scalar_lea.hbm %s2461_s8, 2048  ;;  %p2053_p5 = scmp.lt.u32.totalorder %s2461_s8, %s2749_s0 }
  0x62   : > { %p2048_p2 = scmp.ne.s32.totalorder %s2461_s8, %s2047_s12  ;;  %p2054_p7 = scmp.lt.u32.totalorder %s2052_s14, %s2047_s12 }
  0x63   : > { %p2056_p0 = scmp.lt.u32.totalorder %s2047_s12, %s2461_s8 }
  0x64   : > { %p2050_p10 = pnand %p2726_p6, %p2048_p2  ;;  %p2055_p9 = por %p2054_p7, %p2053_p5 }
  0x66   : > { %p2051_p3 = pneg %p2050_p10  ;;  %p2057_p12 = por %p2056_p0, %p2055_p9 }
  0x68   : > { %p2058_p4 = pnand %p2057_p12, %p2051_p3 }
  0x6a   : > { %2061 = shalt.err (!%p2058_p4)
}
  0x6b   : > { %s2062_s19 = scalar_lea.vmem %s2467_s1, 2048  ;;  %s2267_s20 = smov [#allocation3]  }
  0x6c   : > { %p2063_p2 = scmp.ne.s32.totalorder %s2467_s1, %s2062_s19  ;;  %s2067_s30 = sshll.u32 %s2267_s20, 4  ;;  %s2068_s30 = int_to_ptr.vmem [resolvable:$false] %s2067_s30 }
  0x6d   : > { %s2069_s13 = scalar_lea.vmem %s2068_s30, 4096  ;;  %p2070_p11 = scmp.lt.s32.totalorder %s2467_s1, %s2068_s30 }
  0x6e   : > { %p2065_p10 = pnand %p2063_p2, %p2726_p6  ;;  %p2071_p5 = scmp.lt.s32.totalorder %s2069_s13, %s2062_s19 }
  0x70   : > { %p2066_p8 = pneg %p2065_p10  ;;  %p2072_p7 = por %p2071_p5, %p2070_p11 }
  0x72   : > { %p2073_p9 = pnand %p2072_p7, %p2066_p8 }
  0x74   : > { %2076 = shalt.err (!%p2073_p9)
}
  0x75   : > { %s2268_s14 = smov 128   ;;  %s2269_s12 = smov 8  }
  0x76   : > { %1851 = dma.hbm_to_vmem [thread:$0]  (!%p2463_p1), %s2461_s8, 2048, %s2467_s1, %s2471_s4, %s2268_s14, %s2268_s14, %s2269_s12  }
  0x77   : > { %s296_s9 = scalar_lea.vmem [#allocation8], %s2469_s15  ;;  %s2270_s20 = smov [#allocation9]  }
  0x78   : > { %s2500_s17 = sshll.u32 %s296_s9, 4  ;;  %s230_s0 = sshll.u32 %s2270_s20, 4  ;;  %s231_s0 = int_to_ptr.vmem [resolvable:$true] %s230_s0  ;;  %s2548_s17 = int_to_ptr.vmem [resolvable:$true] %s2500_s17 }
  0x79   : > { %s2077_s13 = scalar_lea.hbm %s2706_s3, 1024 }
  0x7a   : > { %p2078_p4 = scmp.ne.s32.totalorder %s2706_s3, %s2077_s13  ;;  %p2084_p12 = scmp.lt.u32.totalorder %s2077_s13, %s2706_s3 }
  0x7c   : > { %p2080_p8 = pnand %p2078_p4, %p2386_p13 }
  0x7e   : > { %p2081_p11 = pneg %p2080_p8 }
  0x80   : > { %p2086_p3 = pnand %p2084_p12, %p2081_p11 }
  0x82   : > { %2089 = shalt.err (!%p2086_p3)
}
  0x83   : > { %s2090_s1 = scalar_lea.vmem %s231_s0, 1024  ;;  %p2098_p5 = scmp.lt.s32.totalorder %s231_s0, %s231_s0 }
  0x84   : > { %p2091_p0 = scmp.ne.s32.totalorder %s231_s0, %s2090_s1  ;;  %p2099_p7 = scmp.lt.s32.totalorder %s2090_s1, %s2090_s1 }
  0x86   : > { %p2093_p2 = pnand %p2091_p0, %p2386_p13  ;;  %p2100_p9 = por %p2099_p7, %p2098_p5 }
  0x88   : > { %p2094_p10 = pneg %p2093_p2 }
  0x8a   : > { %p2101_p6 = pnand %p2100_p9, %p2094_p10 }
  0x8c   : > { %2104 = shalt.err (!%p2101_p6)
}
  0x8d   : > { %p2751_p4 = scmp.ne.s32.totalorder %s2741_s10, 0  ;;  %s2752_s23 = smov 4  }
  0x8e   : > { %s2753_s8 = smov 64   ;;  %s2271_s28 = smov [#allocation12]  }
  0x8f   : > { %1841 = dma.hbm_to_vmem [thread:$0]  (!%p2751_p4), %s2706_s3, 1024, %s231_s0, [#allocation7], %s2753_s8, %s2753_s8, %s2752_s23  }
  0x90   : > { %s257_s15 = sshll.u32 %s2271_s28, 4  ;;  %s1572_s14 = sshll.u32 %s2257_s25, 10  ;;  %s258_s15 = int_to_ptr.vmem [resolvable:$true] %s257_s15 }
  0x91   : > { %s2527_s20 = scalar_lea.hbm %s2705_s2, %s1572_s14  ;;  %s2105_s13 = scalar_lea.hbm %s2708_s5, 16 }
  0x92   : > { %p2106_p6 = scmp.ne.s32.totalorder %s2708_s5, %s2105_s13  ;;  %p2112_p12 = scmp.lt.u32.totalorder %s2105_s13, %s2708_s5 }
  0x94   : > { %p2108_p8 = pnand %p2106_p6, %p2386_p13 }
  0x96   : > { %p2109_p11 = pneg %p2108_p8 }
  0x98   : > { %p2114_p3 = pnand %p2112_p12, %p2109_p11 }
  0x9a   : > { %2117 = shalt.err (!%p2114_p3)
}
  0x9b   : > { %s2118_s26 = scalar_lea.vmem %s258_s15, 16  ;;  %s2125_s28 = scalar_lea.vmem %s258_s15, 32 }
  0x9c   : > { %p2119_p0 = scmp.ne.s32.totalorder %s258_s15, %s2118_s26  ;;  %p2126_p5 = scmp.lt.s32.totalorder %s258_s15, %s258_s15 }
  0x9d   : > { %p2127_p7 = scmp.lt.s32.totalorder %s2125_s28, %s2118_s26 }
  0x9e   : > { %p2121_p2 = pnand %p2119_p0, %p2386_p13 }
  0x9f   : > { %p2128_p9 = por %p2127_p7, %p2126_p5 }
  0xa0   : > { %p2122_p10 = pneg %p2121_p2 }
  0xa2   : > { %p2129_p1 = pnand %p2128_p9, %p2122_p10 }
  0xa4   : > { %2132 = shalt.err (!%p2129_p1)
}
  0xa5   : > { %1847 = dma.hbm_to_vmem [thread:$0]  (!%p2751_p4), %s2708_s5, 16, %s258_s15, [#allocation11]  }
  0xa6   : > { %s2133_s18 = scalar_lea.hbm %s2527_s20, 1024  ;;  %p2754_p6 = scmp.ne.s32.totalorder %s2750_s11, 0 }
  0xa7   : > { %p2134_p13 = scmp.ne.s32.totalorder %s2527_s20, %s2133_s18  ;;  %s2138_s9 = scalar_lea.hbm %s2705_s2, 2048 }
  0xa8   : > { %p2755_p8 = pneg %p2754_p6  ;;  %p2139_p12 = scmp.lt.u32.totalorder %s2527_s20, %s2705_s2 }
  0xa9   : > { %p2140_p3 = scmp.lt.u32.totalorder %s2138_s9, %s2133_s18  ;;  %p2142_p2 = scmp.lt.u32.totalorder %s2133_s18, %s2527_s20 }
  0xaa   : > { %p2136_p11 = pnand %p2134_p13, %p2755_p8 }
  0xab   : > { %p2141_p0 = por %p2140_p3, %p2139_p12 }
  0xac   : > { %p2137_p1 = pneg %p2136_p11 }
  0xad   : > { %p2143_p4 = por %p2142_p2, %p2141_p0 }
  0xaf   : > { %p2144_p10 = pnand %p2143_p4, %p2137_p1 }
  0xb1   : > { %2147 = shalt.err (!%p2144_p10)
}
  0xb2   : > { %s2148_s15 = scalar_lea.vmem %s2548_s17, 1024  ;;  %p2756_p7 = pmov %p2755_p8 }
  0xb3   : > { %p2149_p5 = scmp.ne.s32.totalorder %s2548_s17, %s2148_s15  ;;  %s2272_s13 = smov [#allocation8]  }
  0xb4   : > { %s2153_s1 = sshll.u32 %s2272_s13, 4  ;;  %s2154_s1 = int_to_ptr.vmem [resolvable:$false] %s2153_s1 }
  0xb5   : > { %p2151_p9 = pnand %p2149_p5, %p2756_p7  ;;  %s2155_s0 = scalar_lea.vmem %s2154_s1, 2048 }
  0xb6   : > { %p2156_p8 = scmp.lt.s32.totalorder %s2548_s17, %s2154_s1  ;;  %p2157_p11 = scmp.lt.s32.totalorder %s2155_s0, %s2148_s15 }
  0xb7   : > { %p2152_p13 = pneg %p2151_p9 }
  0xb8   : > { %p2158_p12 = por %p2157_p11, %p2156_p8 }
  0xba   : > { %p2159_p3 = pnand %p2158_p12, %p2152_p13 }
  0xbc   : > { %2162 = shalt.err (!%p2159_p3)
}
  0xbd   : > { %1854 = dma.hbm_to_vmem [thread:$0]  (!%p2754_p6), %s2527_s20, 1024, %s2548_s17, %s2471_s4, %s2753_s8, %s2753_s8, %s2752_s23  }
  0xbe   : > { %p2757_p1 = scmp.ne.s32.totalorder %s2740_s7, 0 }
  0xbf   : > { %s317_s21 = sand.u32 (!%p2757_p1), 1, %s2342_s27   ;;  %s2581_s26 = sand.u32 (!%p2757_p1), 1, %s2245_s22  }
  0xc0   : > { %315 = sbr.rel (%p2757_p1) target bundleno = 788 (0x314), region = 44  ;;  %s1485_s28 = sshll.u32 (!%p2757_p1), %s2581_s26, 7 }
  0xc1   : > { %s318_s6 = scalar_lea.sflag (!%p2757_p1), [#allocation4], %s317_s21  ;;  %s2584_s11 = scalar_lea.vmem (!%p2757_p1), [#allocation3], %s1485_s28 }
  0xc2   : > { %p2758_p0 = scmp.ne.s32.totalorder (!%p2757_p1), %s2737_s29, 0 }
  0xc7   : > { %2216 = dma.done.wait (%p2758_p0), %s318_s6, 2048  }
  0xc8   : > { %2218 = vsyncadd (%p2758_p0), %s318_s6, 4294965248  ;;  %p2759_p6 = scmp.eq.s32.totalorder %s2342_s27, 0 }
  0xca   : > { %2220 = dma.done.wait (%p2759_p6), [#allocation7], 2048   ;;  %p2760_p2 = pmov %p2759_p6 }
  0xcb   : > { %s1487_s4 = sshll.u32 %s2581_s26, 6 }
  0xcc   : > { %2222 = vsyncadd (%p2760_p2), [#allocation7], 4294965248  ;;  %s2597_s7 = scalar_lea.vmem [#allocation8], %s1487_s4 }
  0xcd   : > { %2224 = dma.done.wait (%p2758_p0), %s318_s6, 1024  }
  0xce   : > { %2226 = vsyncadd (%p2758_p0), %s318_s6, 4294966272  ;;  %p2761_p4 = pmov %p2760_p2 }
  0xcf   : > { %p2762_p10 = pmov %p2760_p2 }
  0xd0   : > { %2228 = dma.done.wait (%p2761_p4), [#allocation7], 1024  }
  0xd1   : > { %2230 = vsyncadd (%p2762_p10), [#allocation7], 4294966272  ;;  %p2763_p5 = pmov %p2760_p2 }
  0xd2   : > { %p2764_p7 = pmov %p2760_p2 }
  0xd3   : > { %2232 = dma.done.wait (%p2763_p5), [#allocation11], 1040  }
  0xd4   : > { %2234 = vsyncadd (%p2764_p7), [#allocation11], 4294966256  ;;  %v1927_v0 = vld [vmem:[#allocation6 + $0x40] sm:$0xff]   ;;  %v1929_v2 = vld [vmem:[#allocation6 + $0x48] sm:$0xff]   ;;  %s2637_s27 = scalar_lea.vmem [#allocation13], %s1487_s4  ;;  %s1589_s17 = sshll.u32 %s2253_s24, 10 }
  0xd5   : > { %v1928_v1 = vld [vmem:[#allocation6] sm:$0xff]   ;;  %1637 = vmatprep.subr.bf16.mxu0 %v1927_v0  ;;  %v1930_v3 = vld [vmem:[#allocation6 + $0x8] sm:$0xff]   ;;  %v1931_v4 = vld [vmem:[#allocation6 + $0x50] sm:$0xff]   ;;  %s1325_s29 = sshll.u32 %s2637_s27, 4  ;;  %s2765_s20 = sld [smem:[#allocation29_spill]]  ;;  %s2647_s29 = int_to_ptr.vmem [resolvable:$true] %s1325_s29 }
  0xd6   : > { %1638 = vmatpush3.bf16.msra.mxu0 %v1928_v1  ;;  %v1932_v5 = vld [vmem:[#allocation6 + $0x10] sm:$0xff]   ;;  %v1933_v6 = vld [vmem:[#allocation6 + $0x58] sm:$0xff]   ;;  %v1935_v8 = vld [vmem:[#allocation6 + $0x60] sm:$0xff]   ;;  %s1312_s18 = scalar_lea.sflag [#allocation5], %s2581_s26  ;;  %s2163_s24 = scalar_lea.vmem %s2647_s29, 1024 }
  0xd7   : > { %1639 = vmatprep.subr.bf16.mxu0 %v1929_v2  ;;  %v1934_v7 = vld [vmem:[#allocation6 + $0x18] sm:$0xff]   ;;  %v1936_v9 = vld [vmem:[#allocation6 + $0x20] sm:$0xff]   ;;  %v1937_v10 = vld [vmem:[#allocation6 + $0x68] sm:$0xff]   ;;  %p2164_p9 = scmp.ne.s32.totalorder %s2647_s29, %s2163_s24  ;;  %p2766_p13 = scmp.ne.s32.totalorder %s2747_s16, 0 }
  0xd8   : > { %v1945_v11 = vld [vmem:[%s2584_s11 + $0x4] ss:$8 sps:$4 sm:$0xff]   ;;  %v1939_v13 = vld [vmem:[#allocation6 + $0x70] sm:$0xff]   ;;  %v1941_v15 = vld [vmem:[#allocation6 + $0x78] sm:$0xff]   ;;  %s2273_s12 = smov [#allocation13]  }
  0xd9   : > { %v1938_v12 = vld [vmem:[#allocation6 + $0x28] sm:$0xff]   ;;  %682 = vmatprep.mubr.bf16.mxu0 %v1945_v11  ;;  %v1940_v14 = vld [vmem:[#allocation6 + $0x30] sm:$0xff]   ;;  %v1942_v16 = vld [vmem:[#allocation6 + $0x38] sm:$0xff]   ;;  %p2165_p8 = pnand %p2164_p9, %p2766_p13  ;;  %s2167_s10 = sshll.u32 %s2273_s12, 4  ;;  %s2168_s10 = int_to_ptr.vmem [resolvable:$false] %s2167_s10 }
  0xda   : > { %1640 = vmatpush3.bf16.msra.mxu0 %v1930_v3  ;;  %v1967_v17 = vld [vmem:[#allocation10] sm:$0xff]   ;;  %v1968_v19 = vld [vmem:[#allocation10 + $0x8] sm:$0xff]   ;;  %v1946_v20 = vld [vmem:[%s2584_s11 + $0x14] ss:$8 sps:$4 sm:$0xff]   ;;  %s2169_s9 = scalar_lea.vmem %s2168_s10, 2048  ;;  %p2170_p12 = scmp.lt.s32.totalorder %s2647_s29, %s2168_s10 }
  0xdb   : > { %1641 = vmatprep.subr.bf16.mxu0 %v1931_v4  ;;  %v1943_v18 = vld [vmem:[%s2584_s11] ss:$8 sps:$4 sm:$0xff]   ;;  %1733 = vmatprep.subr.bf16.mxu1 %v1967_v17  ;;  %v1969_v21 = vld [vmem:[#allocation10 + $0x10] sm:$0xff]   ;;  %v1970_v22 = vld [vmem:[#allocation10 + $0x18] sm:$0xff]   ;;  %s2652_s14 = scalar_lea.hbm %s2765_s20, %s1589_s17  ;;  %p2166_p11 = pneg %p2165_p8 }
  0xdc   : > { %1734 = vmatpush3.bf16.msra.mxu1 %v1967_v17  ;;  %v1948_v23 = vld [vmem:[%s2584_s11 + $0x10] ss:$8 sps:$4 sm:$0xff]   ;;  %v1949_v24 = vld [vmem:[%s2584_s11 + $0x24] ss:$8 sps:$4 sm:$0xff]   ;;  %v1951_v25 = vld [vmem:[%s2584_s11 + $0x20] ss:$8 sps:$4 sm:$0xff]   ;;  %p2171_p3 = scmp.lt.s32.totalorder %s2169_s9, %s2163_s24 }
  0xdd   : > { %1735 = vmatprep.subr.bf16.mxu1 %v1968_v19  ;;  %v1952_v26 = vld [vmem:[%s2584_s11 + $0x34] ss:$8 sps:$4 sm:$0xff]   ;;  %v1954_v27 = vld [vmem:[%s2584_s11 + $0x30] ss:$8 sps:$4 sm:$0xff]   ;;  %v1955_v28 = vld [vmem:[%s2584_s11 + $0x44] ss:$8 sps:$4 sm:$0xff]  }
  0xde   : > { %1642 = vmatpush3.bf16.msra.mxu0 %v1932_v5  ;;  %v1957_v29 = vld [vmem:[%s2584_s11 + $0x40] ss:$8 sps:$4 sm:$0xff]   ;;  %v1958_v30 = vld [vmem:[%s2584_s11 + $0x54] ss:$8 sps:$4 sm:$0xff]   ;;  %v1960_v31 = vld [vmem:[%s2584_s11 + $0x50] ss:$8 sps:$4 sm:$0xff]   ;;  %p2172_p1 = por %p2171_p3, %p2170_p12 }
  0xdf   : > { %1643 = vmatprep.subr.bf16.mxu0 %v1933_v6  ;;  %v1961_v32 = vld [vmem:[%s2584_s11 + $0x64] ss:$8 sps:$4 sm:$0xff]   ;;  %v1963_v33 = vld [vmem:[%s2584_s11 + $0x60] ss:$8 sps:$4 sm:$0xff]   ;;  %v1964_v34 = vld [vmem:[%s2584_s11 + $0x74] ss:$8 sps:$4 sm:$0xff]  }
  0xe0   : > { %1736 = vmatpush3.bf16.msra.mxu1 %v1968_v19  ;;  %v1966_v35 = vld [vmem:[%s2584_s11 + $0x70] ss:$8 sps:$4 sm:$0xff]   ;;  %v1971_v36 = vld [vmem:[#allocation10 + $0x20] sm:$0xff]   ;;  %v1972_v37 = vld [vmem:[#allocation10 + $0x28] sm:$0xff]   ;;  %p2173_p0 = pnand %p2172_p1, %p2166_p11 }
  0xe1   : > { %1737 = vmatprep.subr.bf16.mxu1 %v1969_v21  ;;  %v1973_v38 = vld [vmem:[#allocation10 + $0x30] sm:$0xff]   ;;  %v1974_v39 = vld [vmem:[#allocation10 + $0x38] sm:$0xff]   ;;  %v1975_v40 = vld [vmem:[#allocation9] sm:$0xff]  }
  0xe2   : > { %1644 = vmatpush3.bf16.msra.mxu0 %v1934_v7  ;;  %v1976_v55 = vld [vmem:[#allocation9 + $0x8] sm:$0xff]   ;;  %v1977_v60 = vld [vmem:[#allocation9 + $0x10] sm:$0xff]   ;;  %v1978_v0 = vld [vmem:[#allocation9 + $0x18] sm:$0xff]  }
  0xe3   : > { %1645 = vmatprep.subr.bf16.mxu0 %v1935_v8  ;;  %v1979_v5 = vld [vmem:[#allocation9 + $0x20] sm:$0xff]  }
  0xe4   : > { %1738 = vmatpush3.bf16.msra.mxu1 %v1969_v21 }
  0xe5   : > { %1739 = vmatprep.subr.bf16.mxu1 %v1970_v22 }
  0xe6   : > { %1646 = vmatpush3.bf16.msra.mxu0 %v1936_v9  ;;  %v1980_v9 = vld [vmem:[#allocation9 + $0x28] sm:$0xff]  }
  0xe7   : > { %1647 = vmatprep.subr.bf16.mxu0 %v1937_v10 }
  0xe8   : > { %1740 = vmatpush3.bf16.msra.mxu1 %v1970_v22 }
  0xe9   : > { %1741 = vmatprep.subr.bf16.mxu1 %v1971_v36 }
  0xea   : > { %1648 = vmatpush3.bf16.msra.mxu0 %v1938_v12 }
  0xeb   : > { %1649 = vmatprep.subr.bf16.mxu0 %v1939_v13 }
  0xec   : > { %1742 = vmatpush3.bf16.msra.mxu1 %v1971_v36 }
  0xed   : > { %1743 = vmatprep.subr.bf16.mxu1 %v1972_v37 }
  0xee   : > { %1650 = vmatpush3.bf16.msra.mxu0 %v1940_v14  ;;  %v1981_v14 = vld [vmem:[#allocation9 + $0x30] sm:$0xff]  }
  0xef   : > { %1651 = vmatprep.subr.bf16.mxu0 %v1941_v15 }
  0xf0   : > { %1744 = vmatpush3.bf16.msra.mxu1 %v1972_v37 }
  0xf1   : > { %1745 = vmatprep.subr.bf16.mxu1 %v1973_v38 }
  0xf2   : > { %1652 = vmatpush3.bf16.msra.mxu0 %v1942_v16 }
  0xf4   : > { %1746 = vmatpush3.bf16.msra.mxu1 %v1973_v38 }
  0xf5   : > { %683 = vmatmul.mubr.bf16.vlgmr.msra.gmra.mrb[0].mxu0 %v1943_v18  ;;  %1747 = vmatprep.subr.bf16.mxu1 %v1974_v39  ;;  %v1982_v18 = vld [vmem:[#allocation9 + $0x38] sm:$0xff]  }
  0xf6   : > { %690 = vmatprep.mubr.bf16.mxu0 %v1946_v20 }
  0xf8   : > { %1748 = vmatpush3.bf16.msra.mxu1 %v1974_v39  ;;  %v1983_v39 = vld [vmem:[%s2597_s7] sm:$0xff]  }
  0xf9   : > { %1765 = vmatprep.subr.bf16.mxu1 %v1975_v40 }
  0xfd   : > { %691 = vmatmul.mubr.bf16.gmra.mrb[4].mxu0 %v1948_v23 }
  0xfe   : > { %698 = vmatprep.mubr.bf16.mxu0 %v1949_v24 }
 0x105   : > { %699 = vmatmul.mubr.bf16.gmra.mrb[8].mxu0 %v1951_v25 }
 0x106   : > { %706 = vmatprep.mubr.bf16.mxu0 %v1952_v26 }
 0x10d   : > { %707 = vmatmul.mubr.bf16.gmra.mrb[12].mxu0 %v1954_v27 }
 0x10e   : > { %714 = vmatprep.mubr.bf16.mxu0 %v1955_v28 }
 0x115   : > { %715 = vmatmul.mubr.bf16.gmra.mrb[16].mxu0 %v1957_v29 }
 0x116   : > { %722 = vmatprep.mubr.bf16.mxu0 %v1958_v30 }
 0x11d   : > { %723 = vmatmul.mubr.bf16.gmra.mrb[20].mxu0 %v1960_v31 }
 0x11e   : > { %730 = vmatprep.mubr.bf16.mxu0 %v1961_v32 }
 0x125   : > { %731 = vmatmul.mubr.bf16.gmra.mrb[24].mxu0 %v1963_v33 }
 0x126   : > { %738 = vmatprep.mubr.bf16.mxu0 %v1964_v34 }
 0x12d   : > { %739 = vmatmul.mubr.bf16.gmra.mrb[28].mxu0 %v1966_v35 }
 0x1c8   : > { %v1653_v41 = vpop.f32.mrb[0].mxu0 }
 0x1c9   : > { %v1654_v42 = vpop.f32.mrb[1].mxu0 }
 0x1ca   : > { %v1655_v43 = vadd.f32 %v1654_v42, %v1653_v41  ;;  %v1656_v44 = vpop.f32.mrb[2].mxu0  ;;  %v1984_v41 = vld [vmem:[%s2597_s7 + $0x8] sm:$0xff]   ;;  %v1985_v42 = vld [vmem:[%s2597_s7 + $0x10] sm:$0xff]  }
 0x1cb   : > { %v1657_v45 = vpop.f32.mrb[3].mxu0 }
 0x1cc   : > { %v1658_v46 = vadd.f32 %v1657_v45, %v1656_v44  ;;  %v1987_v44 = vld [vmem:[%s2597_s7 + $0x20] sm:$0xff]   ;;  %v1988_v45 = vld [vmem:[%s2597_s7 + $0x28] sm:$0xff]  }
 0x1ce   : > { %v830_v47 = vpack.c.bf16 %v1658_v46, %v1655_v43  ;;  %v1986_v43 = vld [vmem:[%s2597_s7 + $0x18] sm:$0xff]   ;;  %v1989_v46 = vld [vmem:[%s2597_s7 + $0x30] sm:$0xff]  }
 0x1d0   : > { %v1659_v48 = vpop.f32.mrb[4].mxu0  ;;  %1749 = vmatprep.mubr.bf16.mxu1 %v830_v47  ;;  %v1990_v47 = vld [vmem:[%s2597_s7 + $0x38] sm:$0xff]  }
 0x1d1   : > { %v1660_v49 = vpop.f32.mrb[5].mxu0 }
 0x1d2   : > { %v1661_v50 = vadd.f32 %v1660_v49, %v1659_v48  ;;  %v1662_v51 = vpop.f32.mrb[6].mxu0  ;;  %v1548_v48 = vld [vmem:[#allocation12] ss:$0 sm:$0xff] }
 0x1d3   : > { %v1663_v52 = vpop.f32.mrb[7].mxu0 }
 0x1d4   : > { %v1664_v53 = vadd.f32 %v1663_v52, %v1662_v51 }
 0x1d6   : > { %v831_v54 = vpack.c.bf16 %v1664_v53, %v1661_v50 }
 0x1d8   : > { %v1665_v56 = vpop.f32.mrb[8].mxu0  ;;  %1750 = vmatmul.mubr.bf16.vlgmr.msra.gmra.mrb[0].mxu1 %v831_v54 }
 0x1d9   : > { %v1666_v57 = vpop.f32.mrb[9].mxu0  ;;  %1766 = vmatpush3.bf16.msra.mxu1 %v1975_v40 }
 0x1da   : > { %v1667_v58 = vadd.f32 %v1666_v57, %v1665_v56  ;;  %v1668_v59 = vpop.f32.mrb[10].mxu0  ;;  %1767 = vmatprep.subr.bf16.mxu1 %v1976_v55 }
 0x1db   : > { %v1669_v61 = vpop.f32.mrb[11].mxu0 }
 0x1dc   : > { %v1670_v62 = vadd.f32 %v1669_v61, %v1668_v59 }
 0x1dd   : > { %1768 = vmatpush3.bf16.msra.mxu1 %v1976_v55 }
 0x1de   : > { %v832_v63 = vpack.c.bf16 %v1670_v62, %v1667_v58  ;;  %1769 = vmatprep.subr.bf16.mxu1 %v1977_v60 }
 0x1e0   : > { %v1671_v1 = vpop.f32.mrb[12].mxu0  ;;  %1753 = vmatprep.mubr.bf16.mxu1 %v832_v63 }
 0x1e1   : > { %v1672_v2 = vpop.f32.mrb[13].mxu0  ;;  %1770 = vmatpush3.bf16.msra.mxu1 %v1977_v60 }
 0x1e2   : > { %v1673_v3 = vadd.f32 %v1672_v2, %v1671_v1  ;;  %v1674_v4 = vpop.f32.mrb[14].mxu0  ;;  %1771 = vmatprep.subr.bf16.mxu1 %v1978_v0 }
 0x1e3   : > { %v1675_v6 = vpop.f32.mrb[15].mxu0 }
 0x1e4   : > { %v1676_v7 = vadd.f32 %v1675_v6, %v1674_v4 }
 0x1e5   : > { %1772 = vmatpush3.bf16.msra.mxu1 %v1978_v0 }
 0x1e6   : > { %v833_v8 = vpack.c.bf16 %v1676_v7, %v1673_v3  ;;  %1773 = vmatprep.subr.bf16.mxu1 %v1979_v5 }
 0x1e8   : > { %v1677_v10 = vpop.f32.mrb[16].mxu0  ;;  %1754 = vmatmul.mubr.bf16.gmra.mrb[4].mxu1 %v833_v8 }
 0x1e9   : > { %v1678_v11 = vpop.f32.mrb[17].mxu0  ;;  %1774 = vmatpush3.bf16.msra.mxu1 %v1979_v5 }
 0x1ea   : > { %v1679_v12 = vadd.f32 %v1678_v11, %v1677_v10  ;;  %v1680_v13 = vpop.f32.mrb[18].mxu0  ;;  %1775 = vmatprep.subr.bf16.mxu1 %v1980_v9 }
 0x1eb   : > { %v1681_v15 = vpop.f32.mrb[19].mxu0 }
 0x1ec   : > { %v1682_v16 = vadd.f32 %v1681_v15, %v1680_v13 }
 0x1ed   : > { %1776 = vmatpush3.bf16.msra.mxu1 %v1980_v9 }
 0x1ee   : > { %v834_v17 = vpack.c.bf16 %v1682_v16, %v1679_v12  ;;  %1777 = vmatprep.subr.bf16.mxu1 %v1981_v14 }
 0x1f0   : > { %v1683_v19 = vpop.f32.mrb[20].mxu0  ;;  %1757 = vmatprep.mubr.bf16.mxu1 %v834_v17 }
 0x1f1   : > { %v1684_v20 = vpop.f32.mrb[21].mxu0  ;;  %1778 = vmatpush3.bf16.msra.mxu1 %v1981_v14 }
 0x1f2   : > { %v1685_v21 = vadd.f32 %v1684_v20, %v1683_v19  ;;  %v1686_v22 = vpop.f32.mrb[22].mxu0  ;;  %1779 = vmatprep.subr.bf16.mxu1 %v1982_v18 }
 0x1f3   : > { %v1687_v23 = vpop.f32.mrb[23].mxu0 }
 0x1f4   : > { %v1688_v24 = vadd.f32 %v1687_v23, %v1686_v22 }
 0x1f5   : > { %1780 = vmatpush3.bf16.msra.mxu1 %v1982_v18 }
 0x1f6   : > { %v835_v25 = vpack.c.bf16 %v1688_v24, %v1685_v21 }
 0x1f8   : > { %v1689_v26 = vpop.f32.mrb[24].mxu0  ;;  %1758 = vmatmul.mubr.bf16.gmra.mrb[8].mxu1 %v835_v25 }
 0x1f9   : > { %v1690_v27 = vpop.f32.mrb[25].mxu0 }
 0x1fa   : > { %v1691_v28 = vadd.f32 %v1690_v27, %v1689_v26  ;;  %v1692_v29 = vpop.f32.mrb[26].mxu0 }
 0x1fb   : > { %v1693_v30 = vpop.f32.mrb[27].mxu0 }
 0x1fc   : > { %v1694_v31 = vadd.f32 %v1693_v30, %v1692_v29 }
 0x1fe   : > { %v836_v32 = vpack.c.bf16 %v1694_v31, %v1691_v28 }
 0x200   : > { %v1695_v33 = vpop.f32.mrb[28].mxu0  ;;  %1761 = vmatprep.mubr.bf16.mxu1 %v836_v32 }
 0x201   : > { %v1696_v34 = vpop.f32.mrb[29].mxu0 }
 0x202   : > { %v1697_v35 = vadd.f32 %v1696_v34, %v1695_v33  ;;  %v1698_v36 = vpop.f32.mrb[30].mxu0 }
 0x203   : > { %v1699_v37 = vpop.f32.mrb[31].mxu0 }
 0x204   : > { %v1700_v38 = vadd.f32 %v1699_v37, %v1698_v36 }
 0x206   : > { %v837_v40 = vpack.c.bf16 %v1700_v38, %v1697_v35 }
 0x208   : > { %1762 = vmatmul.mubr.bf16.gmra.mrb[12].mxu1 %v837_v40 }
 0x209   : > { %1781 = vmatprep.mubr.bf16.mxu1 %v1983_v39 }
 0x210   : > { %1782 = vmatmul.mubr.bf16.vlgmr.msra.gmra.mrb[0].mxu1 %v1984_v41 }
 0x211   : > { %1785 = vmatprep.mubr.bf16.mxu1 %v1985_v42 }
 0x218   : > { %1786 = vmatmul.mubr.bf16.gmra.mrb[4].mxu1 %v1986_v43 }
 0x219   : > { %1789 = vmatprep.mubr.bf16.mxu1 %v1987_v44 }
 0x220   : > { %1790 = vmatmul.mubr.bf16.gmra.mrb[8].mxu1 %v1988_v45 }
 0x221   : > { %1793 = vmatprep.mubr.bf16.mxu1 %v1989_v46 }
 0x228   : > { %1794 = vmatmul.mubr.bf16.gmra.mrb[12].mxu1 %v1990_v47 }
 0x2e3   : > { %v1783_v49 = vpop.f32.mrb[0].mxu1 }
 0x2e4   : > { %v1201_v50 = vadd.f32 %v1783_v49, %v1548_v48  ;;  %v1129_v51 = vpop.f32.mrb[1].mxu1 }
 0x2e5   : > { %v1199_v52 = vadd.f32 %v1548_v48, %v1129_v51  ;;  %v1784_v53 = vpop.f32.mrb[2].mxu1 }
 0x2e6   : > { %v1202_v54 = vadd.f32 %v1784_v53, %v1548_v48  ;;  %v1132_v55 = vpop.f32.mrb[3].mxu1  ;;  %v1217_v57 = vmax.f32 %v1201_v50, 0.0 }
 0x2e7   : > { %v1200_v56 = vadd.f32 %v1548_v48, %v1132_v55  ;;  %v1215_v59 = vmax.f32 %v1199_v52, 0.0 }
 0x2e8   : > { %v1218_v58 = vmax.f32 %v1202_v54, 0.0 }
 0x2e9   : > { %v1216_v60 = vmax.f32 %v1200_v56, 0.0 }
 0x2ea   : > { %v1598_v61 = vpack.c.bf16 %v1218_v58, %v1217_v57 }
 0x2eb   : > { %v1593_v62 = vpack.c.bf16 %v1216_v60, %v1215_v59  ;;  %v1787_v63 = vpop.f32.mrb[4].mxu1 }
 0x2ec   : > { %1630 = vst [vmem:[%s2637_s27 + $0x8] sm:$0xff] %v1598_v61   ;;  %v1205_v0 = vadd.f32 %v1787_v63, %v1548_v48  ;;  %v1145_v1 = vpop.f32.mrb[5].mxu1 }
 0x2ed   : > { %1594 = vst [vmem:[%s2637_s27] sm:$0xff] %v1593_v62   ;;  %v1203_v2 = vadd.f32 %v1548_v48, %v1145_v1  ;;  %v1788_v3 = vpop.f32.mrb[6].mxu1 }
 0x2ee   : > { %v1206_v4 = vadd.f32 %v1788_v3, %v1548_v48  ;;  %v1148_v5 = vpop.f32.mrb[7].mxu1  ;;  %v1221_v7 = vmax.f32 %v1205_v0, 0.0 }
 0x2ef   : > { %v1204_v6 = vadd.f32 %v1548_v48, %v1148_v5  ;;  %v1219_v9 = vmax.f32 %v1203_v2, 0.0 }
 0x2f0   : > { %v1222_v8 = vmax.f32 %v1206_v4, 0.0 }
 0x2f1   : > { %v1220_v10 = vmax.f32 %v1204_v6, 0.0 }
 0x2f2   : > { %v1608_v11 = vpack.c.bf16 %v1222_v8, %v1221_v7 }
 0x2f3   : > { %v1603_v12 = vpack.c.bf16 %v1220_v10, %v1219_v9  ;;  %v1791_v13 = vpop.f32.mrb[8].mxu1 }
 0x2f4   : > { %1632 = vst [vmem:[%s2637_s27 + $0x18] sm:$0xff] %v1608_v11   ;;  %v1209_v14 = vadd.f32 %v1791_v13, %v1548_v48  ;;  %v1161_v15 = vpop.f32.mrb[9].mxu1 }
 0x2f5   : > { %1631 = vst [vmem:[%s2637_s27 + $0x10] sm:$0xff] %v1603_v12   ;;  %v1207_v16 = vadd.f32 %v1548_v48, %v1161_v15  ;;  %v1792_v17 = vpop.f32.mrb[10].mxu1 }
 0x2f6   : > { %v1210_v18 = vadd.f32 %v1792_v17, %v1548_v48  ;;  %v1164_v19 = vpop.f32.mrb[11].mxu1  ;;  %v1225_v21 = vmax.f32 %v1209_v14, 0.0 }
 0x2f7   : > { %v1208_v20 = vadd.f32 %v1548_v48, %v1164_v19  ;;  %v1223_v23 = vmax.f32 %v1207_v16, 0.0 }
 0x2f8   : > { %v1226_v22 = vmax.f32 %v1210_v18, 0.0 }
 0x2f9   : > { %v1224_v24 = vmax.f32 %v1208_v20, 0.0 }
 0x2fa   : > { %v1618_v25 = vpack.c.bf16 %v1226_v22, %v1225_v21 }
 0x2fb   : > { %v1613_v26 = vpack.c.bf16 %v1224_v24, %v1223_v23  ;;  %v1795_v27 = vpop.f32.mrb[12].mxu1 }
 0x2fc   : > { %1634 = vst [vmem:[%s2637_s27 + $0x28] sm:$0xff] %v1618_v25   ;;  %v1213_v28 = vadd.f32 %v1795_v27, %v1548_v48  ;;  %v1177_v29 = vpop.f32.mrb[13].mxu1 }
 0x2fd   : > { %1633 = vst [vmem:[%s2637_s27 + $0x20] sm:$0xff] %v1613_v26   ;;  %v1211_v30 = vadd.f32 %v1548_v48, %v1177_v29  ;;  %v1796_v31 = vpop.f32.mrb[14].mxu1 }
 0x2fe   : > { %v1214_v32 = vadd.f32 %v1796_v31, %v1548_v48  ;;  %v1180_v33 = vpop.f32.mrb[15].mxu1  ;;  %v1229_v35 = vmax.f32 %v1213_v28, 0.0 }
 0x2ff   : > { %v1212_v34 = vadd.f32 %v1548_v48, %v1180_v33  ;;  %v1227_v37 = vmax.f32 %v1211_v30, 0.0 }
 0x300   : > { %v1230_v36 = vmax.f32 %v1214_v32, 0.0 }
 0x301   : > { %v1228_v38 = vmax.f32 %v1212_v34, 0.0 }
 0x302   : > { %v1628_v39 = vpack.c.bf16 %v1230_v36, %v1229_v35 }
 0x303   : > { %v1623_v40 = vpack.c.bf16 %v1228_v38, %v1227_v37 }
 0x304   : > { %1636 = vst [vmem:[%s2637_s27 + $0x38] sm:$0xff] %v1628_v39  }
 0x305   : > { %1635 = vst [vmem:[%s2637_s27 + $0x30] sm:$0xff] %v1623_v40  }
 0x306   : > { %2176 = shalt.err (!%p2173_p0)
}
 0x307   : > { %s2177_s19 = scalar_lea.hbm %s2652_s14, 1024  ;;  %s2181_s13 = scalar_lea.hbm %s2765_s20, 2048 }
 0x308   : > { %p2178_p6 = scmp.ne.s32.totalorder %s2652_s14, %s2177_s19  ;;  %p2182_p10 = scmp.lt.u32.totalorder %s2652_s14, %s2765_s20 }
 0x309   : > { %p2183_p5 = scmp.lt.u32.totalorder %s2181_s13, %s2177_s19  ;;  %p2185_p9 = scmp.lt.u32.totalorder %s2177_s19, %s2652_s14 }
 0x30a   : > { %p2179_p2 = pnand %p2178_p6, %p2766_p13 }
 0x30b   : > { %p2184_p7 = por %p2183_p5, %p2182_p10 }
 0x30c   : > { %p2180_p4 = pneg %p2179_p2 }
 0x30d   : > { %p2186_p8 = por %p2185_p9, %p2184_p7 }
 0x30f   : > { %p2187_p11 = pnand %p2186_p8, %p2180_p4 }
 0x311   : > { %2190 = shalt.err (!%p2187_p11)
}
 0x312   : > { %s2274_s21 = smov 64   ;;  %s2275_s28 = smov 4  }
 0x313   : > { %1833 = dma.vmem_to_hbm [thread:$0]  (%p2766_p13), %s2647_s29, 1024, %s2652_s14, %s1312_s18, %s2274_s21, %s2274_s21, %s2275_s28  }
 0x314 PF: > { %s2767_s6 = sld [smem:[#allocation20_spill]]  ;;  %s2768_s11 = sld [smem:[#allocation23_spill]] }
 0x315   : > { %s2769_s4 = sld [smem:[#allocation22_spill]] }
 0x31a   : > { %s1340_s7 = sand.u32 1, %s2767_s6   ;;  %p2770_p12 = scmp.ne.s32.totalorder %s2768_s11, 0 }
 0x31b   : > { %p2771_p3 = scmp.ge.s32.totalorder %s2769_s4, 2  ;;  %s1341_s27 = scalar_lea.sflag [#allocation5], %s1340_s7 }
 0x31d   : > { %p1856_p1 = pnand %p2771_p3, %p2770_p12 }
 0x31f   : > { %2236 = dma.done.wait (!%p1856_p1), %s1341_s27, 1024  }
 0x320   : > { %2238 = vsyncadd (!%p1856_p1), %s1341_s27, 4294966272  ;;  %s24_s26 = sadd.s32 1, %s2769_s4   ;;  %s2772_s17 = sld [smem:[#allocation21_spill]] }
 0x321   : > { %p21_p0 = scmp.ge.s32.totalorder %s24_s26, 4   ;;  %s2773_s23 = sld [smem:[#allocation25_spill]] }
 0x322   : > { %s2774_s16 = sld [smem:[#allocation24_spill]]  ;;  %s2775_s21 = smov %s2245_s22 }
 0x323   : > { %s2777_s24 = smov %s2257_s25  ;;  %23 = sbr.rel (!%p21_p0) target bundleno = 13 (0xd), region = 125 }
 0x326   : > { %s2776_s22 = smov %s2772_s17 }
 0x328   : > { %s2778_s25 = smov %s2774_s16 }
 0x32a   :  { %1346 = vsyncpa [#allocation4], 1 }
 0x32b   :  { %1348 = vsyncpa [#allocation4 + $0x1], 1 }
 0x32c   :  { %1349 = vsyncpa [#allocation7], 1 }
 0x32d   :  { %1350 = vsyncpa [#allocation11], 1 }
 0x32e   :  { %1351 = vsyncpa [#allocation5], 1 }
 0x32f   :  { %1353 = vsyncpa [#allocation5 + $0x1], 1 }

</bundles_post_ra>
